<compile_context>
chip_gen: v6e
topology: v6e:2x2x1
jax: 0.10.0
libtpu: 0.0.40
codegen_flags: <defaults>
</compile_context>

<pallas_src>
import math
from typing import Dict

import jax
import jax.numpy as jnp
from jax.experimental import pallas as pl
from jax.experimental.pallas import tpu as pltpu

NUM_QUBITS = 4
_INV_SQRT2 = 1.0 / math.sqrt(2.0)


def _round_up(n: int, m: int) -> int:
    return ((n + m - 1) // m) * m


def _router_kernel(x_ref, w1_ref, b1_ref, w2a_ref, b2a_ref, w2i_ref, b2i_ref,
                   cos_ref, sin_ref, routed_ref, extras_ref):
    Q = NUM_QUBITS
    x = x_ref[...]                                                   # (TB, 2Q) f32

    # quantum_encoder: Linear(2Q->4Q) -> GELU (exact, erf) -> Linear(4Q->Q) [amp half only]
    h = jnp.dot(x, w1_ref[...], preferred_element_type=jnp.float32) + b1_ref[...]
    h = 0.5 * h * (1.0 + jax.lax.erf(h * _INV_SQRT2))                # nn.GELU() exact

    # amplitude = h @ w2[:, :Q] + b2[:, :Q]
    amp = jnp.dot(h, w2a_ref[...], preferred_element_type=jnp.float32) + b2a_ref[...]
    # interference (pre-phase) = amp @ ig, folded into the Linear: h @ (w2a@ig) + b2a@ig
    interf = jnp.dot(h, w2i_ref[...], preferred_element_type=jnp.float32) + b2i_ref[...]

    # |amplitude| + |interference * e^{i phi}| == |amplitude| + |interference|
    rw = jax.nn.sigmoid(jnp.abs(amp) + jnp.abs(interf))              # (TB, Q)

    # TODO(synk): PyTorch's `x * routing_weights` is a broadcast mismatch
    # ((B, 2Q) * (B, Q) fails for any valid input); we tile the routing weights
    # across both halves of x as the natural gating interpretation.
    routed_ref[:, :Q] = x[:, :Q] * rw
    routed_ref[:, Q:] = x[:, Q:] * rw

    # Packed extras: [ routing_weights | interference.real | interference.imag ]
    extras_ref[:, :Q] = rw
    extras_ref[:, Q:2 * Q] = interf * cos_ref[...]
    extras_ref[:, 2 * Q:] = interf * sin_ref[...]


def quantum_inspired_router(x: jnp.ndarray,
                            params: Dict[str, jnp.ndarray],
                            *,
                            batch_tile: int = 4096) -> Dict[str, jnp.ndarray]:
    B = x.shape[0]
    Q = NUM_QUBITS
    D_IN, D_HID = 2 * Q, 4 * Q

    # --- constant-folded parameter prep (tiny, done once per call) -----------
    w1, b1 = params["w1"], params["b1"]
    w2a = params["w2"][:, :Q]                 # dead "phase" half of Linear dropped
    b2a = params["b2"][:, :Q]
    w2i = w2a @ params["ig"]                  # fold interference einsum into Linear
    b2i = b2a @ params["ig"]
    cosp = jnp.cos(params["phase"])           # (1, Q)
    sinp = jnp.sin(params["phase"])           # (1, Q)

    # --- batch tiling (pad to a multiple of the tile, slice back after) ------
    TB = min(batch_tile, _round_up(B, 8))     # multiple of 8 sublanes
    Bp = _round_up(B, TB)
    x_p = jnp.pad(x, ((0, Bp - B), (0, 0))) if Bp != B else x
    grid = (Bp // TB,)

    def _const(shape):                        # params: resident, fetched once
        return pl.BlockSpec(shape, lambda i: (0, 0))

    routed, extras = pl.pallas_call(
        _router_kernel,
        out_shape=(
            jax.ShapeDtypeStruct((Bp, D_IN), jnp.float32),   # routed_features
            jax.ShapeDtypeStruct((Bp, 3 * Q), jnp.float32),  # [qw | re | im]
        ),
        grid=grid,
        in_specs=[
            pl.BlockSpec((TB, D_IN), lambda i: (i, 0)),      # x
            _const((D_IN, D_HID)),                           # w1
            _const((1, D_HID)),                              # b1
            _const((D_HID, Q)),                              # w2a
            _const((1, Q)),                                  # b2a
            _const((D_HID, Q)),                              # w2i
            _const((1, Q)),                                  # b2i
            _const((1, Q)),                                  # cos(phase)
            _const((1, Q)),                                  # sin(phase)
        ],
        out_specs=(
            pl.BlockSpec((TB, D_IN), lambda i: (i, 0)),
            pl.BlockSpec((TB, 3 * Q), lambda i: (i, 0)),
        ),
        compiler_params=pltpu.CompilerParams(
            dimension_semantics=("parallel",)),
    )(x_p, w1, b1, w2a, b2a, w2i, b2i, cosp, sinp)

    routed = routed[:B]
    qw = extras[:B, :Q]
    ire = extras[:B, Q:2 * Q]
    iim = extras[:B, 2 * Q:]

    interference = jax.lax.complex(ire, iim)                 # complex64, like PyTorch
    return {
        "routed_features": routed,
        "interference_patterns": interference,
        "quantum_weights": qw,
    }


def init_params(key: jax.Array, num_qubits: int = NUM_QUBITS) -> Dict[str, jnp.ndarray]:
    """Deterministic synthetic parameters matching the module's shapes."""
    k1, k2, k3, k4, k5, k6 = jax.random.split(key, 6)
    d_in, d_hid = 2 * num_qubits, 4 * num_qubits
    # PyTorch-style uniform(-1/sqrt(fan_in), 1/sqrt(fan_in)) for the Linears.
    lim1 = 1.0 / math.sqrt(d_in)
    lim2 = 1.0 / math.sqrt(d_hid)
    return {
        "w1": jax.random.uniform(k1, (d_in, d_hid), jnp.float32, -lim1, lim1),
        "b1": jax.random.uniform(k2, (1, d_hid), jnp.float32, -lim1, lim1),
        "w2": jax.random.uniform(k3, (d_hid, d_in), jnp.float32, -lim2, lim2),
        "b2": jax.random.uniform(k4, (1, d_in), jnp.float32, -lim2, lim2),
        "ig": jax.random.normal(k5, (num_qubits, num_qubits), jnp.float32),
        "phase": jax.random.normal(k6, (1, num_qubits), jnp.float32),
    }


def _reference(x, p):
    """Pure-JAX reference of the same semantics (for a sanity check)."""
    h = x @ p["w1"] + p["b1"]
    h = 0.5 * h * (1.0 + jax.lax.erf(h / math.sqrt(2.0)))
    qs = h @ p["w2"] + p["b2"]
    amp = qs[:, :NUM_QUBITS]
    interf = amp @ p["ig"]
    interference = interf * jnp.exp(1j * p["phase"].astype(jnp.complex64))
    rw = jax.nn.sigmoid(jnp.abs(amp) + jnp.abs(interference).astype(jnp.float32))
    routed = x * jnp.concatenate([rw, rw], axis=-1)
    return routed, interference, rw


if __name__ == "__main__":
    key = jax.random.PRNGKey(0)
    pkey, xkey = jax.random.split(key)

    params = init_params(pkey)
    B = 8
    x = jax.random.normal(xkey, (B, 2 * NUM_QUBITS), jnp.float32)

    out = quantum_inspired_router(x, params)
    jax.block_until_ready(out)

    # sanity check against pure-JAX reference (tolerance covers the exact
    # algebraic refactor of folding ig into the second Linear)
    routed_ref, interf_ref, qw_ref = _reference(x, params)
    assert jnp.allclose(out["routed_features"], routed_ref, atol=1e-4, rtol=1e-4)
    assert jnp.allclose(out["interference_patterns"], interf_ref, atol=1e-4, rtol=1e-4)
    assert jnp.allclose(out["quantum_weights"], qw_ref, atol=1e-4, rtol=1e-4)

    print("KERNEL_OK")
</pallas_src>

<mosaic_0001>
module attributes {stable_mosaic.version = 11 : i64} {
  func.func @_router_kernel(%arg0: i32, %arg1: memref<8x8xf32, #tpu.memory_space<vmem>>, %arg2: memref<8x16xf32, #tpu.memory_space<vmem>>, %arg3: memref<1x16xf32, #tpu.memory_space<vmem>>, %arg4: memref<16x4xf32, #tpu.memory_space<vmem>>, %arg5: memref<1x4xf32, #tpu.memory_space<vmem>>, %arg6: memref<16x4xf32, #tpu.memory_space<vmem>>, %arg7: memref<1x4xf32, #tpu.memory_space<vmem>>, %arg8: memref<1x4xf32, #tpu.memory_space<vmem>>, %arg9: memref<1x4xf32, #tpu.memory_space<vmem>>, %arg10: memref<8x8xf32, #tpu.memory_space<vmem>>, %arg11: memref<8x12xf32, #tpu.memory_space<vmem>>) attributes {dimension_semantics = [#tpu.dimension_semantics<parallel>], iteration_bounds = array<i64: 1>, scalar_prefetch = 0 : i64, scratch_operands = 0 : i64, tpu.core_type = #tpu.core_type<tc>, window_params = [{transform_indices = @transform_0, window_bounds = array<i64: 8, 8>}, {pipeline_mode = #tpu.pipeline_mode<synchronous>, transform_indices = @transform_1, window_bounds = array<i64: 8, 16>}, {pipeline_mode = #tpu.pipeline_mode<synchronous>, transform_indices = @transform_2, window_bounds = array<i64: 1, 16>}, {pipeline_mode = #tpu.pipeline_mode<synchronous>, transform_indices = @transform_3, window_bounds = array<i64: 16, 4>}, {pipeline_mode = #tpu.pipeline_mode<synchronous>, transform_indices = @transform_4, window_bounds = array<i64: 1, 4>}, {pipeline_mode = #tpu.pipeline_mode<synchronous>, transform_indices = @transform_5, window_bounds = array<i64: 16, 4>}, {pipeline_mode = #tpu.pipeline_mode<synchronous>, transform_indices = @transform_6, window_bounds = array<i64: 1, 4>}, {pipeline_mode = #tpu.pipeline_mode<synchronous>, transform_indices = @transform_7, window_bounds = array<i64: 1, 4>}, {pipeline_mode = #tpu.pipeline_mode<synchronous>, transform_indices = @transform_8, window_bounds = array<i64: 1, 4>}, {transform_indices = @transform_9, window_bounds = array<i64: 8, 8>}, {transform_indices = @transform_10, window_bounds = array<i64: 8, 12>}]} {
    %c0 = arith.constant 0 : index
    %c0_0 = arith.constant 0 : index
    %0 = vector.load %arg1[%c0, %c0_0] : memref<8x8xf32, #tpu.memory_space<vmem>>, vector<8x8xf32>
    %c0_1 = arith.constant 0 : index
    %c0_2 = arith.constant 0 : index
    %1 = vector.load %arg2[%c0_1, %c0_2] : memref<8x16xf32, #tpu.memory_space<vmem>>, vector<8x16xf32>
    %cst = arith.constant dense<0.000000e+00> : vector<8x16xf32>
    %2 = tpu.matmul %0, %1, %cst {dimension_numbers = #tpu.dot_dimension_numbers<[1], [0], [0], [1], [0, 0, 1, 1], [], []>} : vector<8x8xf32>, vector<8x16xf32>, vector<8x16xf32> -> vector<8x16xf32>
    %c0_3 = arith.constant 0 : index
    %c0_4 = arith.constant 0 : index
    %3 = vector.load %arg3[%c0_3, %c0_4] : memref<1x16xf32, #tpu.memory_space<vmem>>, vector<1x16xf32>
    %4 = vector.broadcast %3 : vector<1x16xf32> to vector<8x16xf32>
    %5 = arith.addf %2, %4 : vector<8x16xf32>
    %cst_5 = arith.constant 5.000000e-01 : f32
    %6 = vector.broadcast %cst_5 : f32 to vector<8x16xf32>
    %7 = arith.mulf %6, %5 : vector<8x16xf32>
    %cst_6 = arith.constant 0.707106769 : f32
    %8 = vector.broadcast %cst_6 : f32 to vector<8x16xf32>
    %9 = arith.mulf %5, %8 : vector<8x16xf32>
    %10 = math.erf %9 : vector<8x16xf32>
    %cst_7 = arith.constant 1.000000e+00 : f32
    %11 = vector.broadcast %cst_7 : f32 to vector<8x16xf32>
    %12 = arith.addf %11, %10 : vector<8x16xf32>
    %13 = arith.mulf %7, %12 : vector<8x16xf32>
    %c0_8 = arith.constant 0 : index
    %c0_9 = arith.constant 0 : index
    %14 = vector.load %arg4[%c0_8, %c0_9] : memref<16x4xf32, #tpu.memory_space<vmem>>, vector<16x4xf32>
    %cst_10 = arith.constant dense<0.000000e+00> : vector<8x4xf32>
    %15 = tpu.matmul %13, %14, %cst_10 {dimension_numbers = #tpu.dot_dimension_numbers<[1], [0], [0], [1], [0, 0, 1, 1], [], []>} : vector<8x16xf32>, vector<16x4xf32>, vector<8x4xf32> -> vector<8x4xf32>
    %c0_11 = arith.constant 0 : index
    %c0_12 = arith.constant 0 : index
    %16 = vector.load %arg5[%c0_11, %c0_12] : memref<1x4xf32, #tpu.memory_space<vmem>>, vector<1x4xf32>
    %17 = vector.broadcast %16 : vector<1x4xf32> to vector<8x4xf32>
    %18 = arith.addf %15, %17 : vector<8x4xf32>
    %c0_13 = arith.constant 0 : index
    %c0_14 = arith.constant 0 : index
    %19 = vector.load %arg6[%c0_13, %c0_14] : memref<16x4xf32, #tpu.memory_space<vmem>>, vector<16x4xf32>
    %cst_15 = arith.constant dense<0.000000e+00> : vector<8x4xf32>
    %20 = tpu.matmul %13, %19, %cst_15 {dimension_numbers = #tpu.dot_dimension_numbers<[1], [0], [0], [1], [0, 0, 1, 1], [], []>} : vector<8x16xf32>, vector<16x4xf32>, vector<8x4xf32> -> vector<8x4xf32>
    %c0_16 = arith.constant 0 : index
    %c0_17 = arith.constant 0 : index
    %21 = vector.load %arg7[%c0_16, %c0_17] : memref<1x4xf32, #tpu.memory_space<vmem>>, vector<1x4xf32>
    %22 = vector.broadcast %21 : vector<1x4xf32> to vector<8x4xf32>
    %23 = arith.addf %20, %22 : vector<8x4xf32>
    %24 = math.absf %18 : vector<8x4xf32>
    %25 = math.absf %23 : vector<8x4xf32>
    %26 = arith.addf %24, %25 : vector<8x4xf32>
    %27 = arith.negf %26 : vector<8x4xf32>
    %28 = math.exp %27 : vector<8x4xf32>
    %cst_18 = arith.constant 1.000000e+00 : f32
    %29 = vector.broadcast %cst_18 : f32 to vector<8x4xf32>
    %30 = arith.addf %29, %28 : vector<8x4xf32>
    %31 = arith.divf %29, %30 : vector<8x4xf32>
    %32 = vector.extract_strided_slice %0 {offsets = [0, 0], sizes = [8, 4], strides = [1, 1]} : vector<8x8xf32> to vector<8x4xf32>
    %33 = arith.mulf %32, %31 : vector<8x4xf32>
    %c0_19 = arith.constant 0 : index
    %c0_20 = arith.constant 0 : index
    %34 = vector.load %arg10[%c0_19, %c0_20] : memref<8x8xf32, #tpu.memory_space<vmem>>, vector<8x4xf32>
    tpu.vector_store %arg10[%c0_19, %c0_20], %33 {strides = array<i32>} : memref<8x8xf32, #tpu.memory_space<vmem>>, vector<8x4xf32>,
    %35 = vector.extract_strided_slice %0 {offsets = [0, 4], sizes = [8, 4], strides = [1, 1]} : vector<8x8xf32> to vector<8x4xf32>
    %36 = arith.mulf %35, %31 : vector<8x4xf32>
    %c0_21 = arith.constant 0 : index
    %c4 = arith.constant 4 : index
    %37 = vector.load %arg10[%c0_21, %c4] : memref<8x8xf32, #tpu.memory_space<vmem>>, vector<8x4xf32>
    tpu.vector_store %arg10[%c0_21, %c4], %36 {strides = array<i32>} : memref<8x8xf32, #tpu.memory_space<vmem>>, vector<8x4xf32>,
    %c0_22 = arith.constant 0 : index
    %c0_23 = arith.constant 0 : index
    %38 = vector.load %arg11[%c0_22, %c0_23] : memref<8x12xf32, #tpu.memory_space<vmem>>, vector<8x4xf32>
    tpu.vector_store %arg11[%c0_22, %c0_23], %31 {strides = array<i32>} : memref<8x12xf32, #tpu.memory_space<vmem>>, vector<8x4xf32>,
    %c0_24 = arith.constant 0 : index
    %c0_25 = arith.constant 0 : index
    %39 = vector.load %arg8[%c0_24, %c0_25] : memref<1x4xf32, #tpu.memory_space<vmem>>, vector<1x4xf32>
    %40 = vector.broadcast %39 : vector<1x4xf32> to vector<8x4xf32>
    %41 = arith.mulf %23, %40 : vector<8x4xf32>
    %c0_26 = arith.constant 0 : index
    %c4_27 = arith.constant 4 : index
    %42 = vector.load %arg11[%c0_26, %c4_27] : memref<8x12xf32, #tpu.memory_space<vmem>>, vector<8x4xf32>
    tpu.vector_store %arg11[%c0_26, %c4_27], %41 {strides = array<i32>} : memref<8x12xf32, #tpu.memory_space<vmem>>, vector<8x4xf32>,
    %c0_28 = arith.constant 0 : index
    %c0_29 = arith.constant 0 : index
    %43 = vector.load %arg9[%c0_28, %c0_29] : memref<1x4xf32, #tpu.memory_space<vmem>>, vector<1x4xf32>
    %44 = vector.broadcast %43 : vector<1x4xf32> to vector<8x4xf32>
    %45 = arith.mulf %23, %44 : vector<8x4xf32>
    %c0_30 = arith.constant 0 : index
    %c8 = arith.constant 8 : index
    %46 = vector.load %arg11[%c0_30, %c8] : memref<8x12xf32, #tpu.memory_space<vmem>>, vector<8x4xf32>
    tpu.vector_store %arg11[%c0_30, %c8], %45 {strides = array<i32>} : memref<8x12xf32, #tpu.memory_space<vmem>>, vector<8x4xf32>,
    return
  }
  func.func @transform_0(%arg0: i32) -> (i32, i32) {
    %c0_i32 = arith.constant 0 : i32
    %c0_i32_0 = arith.constant 0 : i32
    return %arg0, %c0_i32 : i32, i32
  }
  func.func @transform_1(%arg0: i32) -> (i32, i32) {
    %c0_i32 = arith.constant 0 : i32
    %c0_i32_0 = arith.constant 0 : i32
    %c0_i32_1 = arith.constant 0 : i32
    return %c0_i32, %c0_i32_0 : i32, i32
  }
  func.func @transform_2(%arg0: i32) -> (i32, i32) {
    %c0_i32 = arith.constant 0 : i32
    %c0_i32_0 = arith.constant 0 : i32
    %c0_i32_1 = arith.constant 0 : i32
    return %c0_i32, %c0_i32_0 : i32, i32
  }
  func.func @transform_3(%arg0: i32) -> (i32, i32) {
    %c0_i32 = arith.constant 0 : i32
    %c0_i32_0 = arith.constant 0 : i32
    %c0_i32_1 = arith.constant 0 : i32
    return %c0_i32, %c0_i32_0 : i32, i32
  }
  func.func @transform_4(%arg0: i32) -> (i32, i32) {
    %c0_i32 = arith.constant 0 : i32
    %c0_i32_0 = arith.constant 0 : i32
    %c0_i32_1 = arith.constant 0 : i32
    return %c0_i32, %c0_i32_0 : i32, i32
  }
  func.func @transform_5(%arg0: i32) -> (i32, i32) {
    %c0_i32 = arith.constant 0 : i32
    %c0_i32_0 = arith.constant 0 : i32
    %c0_i32_1 = arith.constant 0 : i32
    return %c0_i32, %c0_i32_0 : i32, i32
  }
  func.func @transform_6(%arg0: i32) -> (i32, i32) {
    %c0_i32 = arith.constant 0 : i32
    %c0_i32_0 = arith.constant 0 : i32
    %c0_i32_1 = arith.constant 0 : i32
    return %c0_i32, %c0_i32_0 : i32, i32
  }
  func.func @transform_7(%arg0: i32) -> (i32, i32) {
    %c0_i32 = arith.constant 0 : i32
    %c0_i32_0 = arith.constant 0 : i32
    %c0_i32_1 = arith.constant 0 : i32
    return %c0_i32, %c0_i32_0 : i32, i32
  }
  func.func @transform_8(%arg0: i32) -> (i32, i32) {
    %c0_i32 = arith.constant 0 : i32
    %c0_i32_0 = arith.constant 0 : i32
    %c0_i32_1 = arith.constant 0 : i32
    return %c0_i32, %c0_i32_0 : i32, i32
  }
  func.func @transform_9(%arg0: i32) -> (i32, i32) {
    %c0_i32 = arith.constant 0 : i32
    %c0_i32_0 = arith.constant 0 : i32
    return %arg0, %c0_i32 : i32, i32
  }
  func.func @transform_10(%arg0: i32) -> (i32, i32) {
    %c0_i32 = arith.constant 0 : i32
    %c0_i32_0 = arith.constant 0 : i32
    return %arg0, %c0_i32 : i32, i32
  }
}

</mosaic_0001>

<bundles_post_ra>
// kernel: tpu_custom_call.1
= control target key start
LH: loop header
LB: loop body
LE: loop exit
PB: predicated region body
PF: predicated region fallthrough
CT: control target
= control target key end

     0   :  { %16 = vsyncpa [#allocation3], 0  ;;  %vm45_vm0 = vcmask 64512   ;;  %v453_v2 = vmov 0.0   ;;  %vm454_vm1 = vmmov 0   ;;  %s560_s0 = inlined_call_operand.vmem [shape: f32[8,8], index: 0, kind: input, shape index: {}]   ;;  %s561_s1 = inlined_call_operand.vmem [shape: f32[8,16], index: 1, kind: input, shape index: {}]   ;;  %s562_s2 = inlined_call_operand.vmem [shape: f32[1,16], index: 2, kind: input, shape index: {}]   ;;  %s563_s3 = inlined_call_operand.vmem [shape: f32[16,4], index: 3, kind: input, shape index: {}]   ;;  %s564_s4 = inlined_call_operand.vmem [shape: f32[1,4], index: 4, kind: input, shape index: {}]   ;;  %s565_s5 = inlined_call_operand.vmem [shape: f32[16,4], index: 5, kind: input, shape index: {}]   ;;  %s566_s6 = inlined_call_operand.vmem [shape: f32[1,4], index: 6, kind: input, shape index: {}]   ;;  %s567_s7 = inlined_call_operand.vmem [shape: f32[1,4], index: 7, kind: input, shape index: {}]   ;;  %s568_s8 = inlined_call_operand.vmem [shape: f32[1,4], index: 8, kind: input, shape index: {}]   ;;  %s569_s9 = inlined_call_operand.hbm [shape: f32[8,8], index: 9, kind: output, shape index: {0}]   ;;  %s570_s10 = inlined_call_operand.hbm [shape: f32[8,12], index: 10, kind: output, shape index: {1}]  }
   0x1   :  { %v37_v0 = vld [vmem:[%s561_s1] sm:$0xff]  ;;  %378 = vmatprep.subr.mxu0 %v453_v2  ;;  %380 = vmatprep.mubr.msk.f32.mxu0 %vm454_vm1, %v453_v2 }
   0x2   :  { %v520_v1 = vld [vmem:[%s560_s0] sm:$0xff] }
   0x3   :  { %17 = vsyncpa [#allocation5], 0  ;;  %379 = vmatpush3.msra.mxu0 %v37_v0  ;;  %383 = vmatprep.subr.mxu1 %v453_v2  ;;  %v208_v3 = vld [vmem:[%s565_s5 + $0x8] sm:$0xff]  ;;  %v207_v5 = vld [vmem:[%s565_s5] sm:$0xff]  ;;  %vm133_vm2 = vcmask 130048   ;;  %s455_s28 = smov 8  }
   0x4   :  { %381 = vmatmul.mubr.msk.f32.vlgmr.msra.gmra.mxu0 %vm45_vm0, %v520_v1  ;;  %390 = vmatprep.subr.mxu0 %v453_v2  ;;  %v125_v4 = vld [vmem:[%s563_s3 + $0x8] sm:$0xff]  ;;  %v124_v6 = vld [vmem:[%s563_s3] sm:$0xff]  ;;  %vm296_vm3 = vcmask 31744   ;;  %s457_s29 = smov [#allocation2]   ;;  %vm303_vm4 = vcmask 64544   ;;  %s458_s11 = smov [#allocation4]  }
   0x5   :  { %387 = vmatprep.mubr.msk.f32.mxu1 %vm454_vm1, %v453_v2  ;;  %394 = vmatprep.mubr.msk.f32.mxu0 %vm454_vm1, %v453_v2  ;;  %v361_v7 = vld [vmem:[%s562_s2] ss:$0 sm:$0xff]  ;;  %s339_s30 = sshll.u32 %s457_s29, 4  ;;  %s349_s12 = sshll.u32 %s458_s11, 4  ;;  %vm331_vm5 = vcmask 97344   ;;  %s340_s30 = int_to_ptr.vmem [resolvable:$true] %s339_s30  ;;  %s350_s12 = int_to_ptr.vmem [resolvable:$true] %s349_s12 }
   0x6   :  { %391 = vmatpush3.msra.mxu0 %v208_v3  ;;  %384 = vmatpush3.msra.mxu1 %v125_v4  ;;  %v363_v16 = vld [vmem:[%s564_s4] ss:$0 sm:$0xff]  ;;  %p414_p1 = scmp.lt.s32.totalorder %s340_s30, %s340_s30 }
   0x7   :  { %392 = vmatprep.subr.mxu0 %v453_v2  ;;  %385 = vmatprep.subr.mxu1 %v453_v2  ;;  %v365_v17 = vld [vmem:[%s566_s6] ss:$0 sm:$0xff] }
   0x8   :  { %393 = vmatpush3.msra.mxu0 %v207_v5  ;;  %386 = vmatpush3.msra.mxu1 %v124_v6  ;;  %v369_v20 = vld [vmem:[%s568_s8] ss:$0 sm:$0xff]  ;;  %s456_s8 = smov 4  }
   0x9   :  { %v368_v33 = vld [vmem:[%s567_s7] ss:$0 sm:$0xff]  ;;  %s409_s7 = scalar_lea.vmem %s340_s30, 128 }
   0xa   :  { %p410_p0 = scmp.ne.s32.totalorder %s340_s30, %s409_s7  ;;  %p415_p2 = scmp.lt.s32.totalorder %s409_s7, %s409_s7 }
   0xc   :  { %p416_p3 = por %p415_p2, %p414_p1 }
   0xe   :  { %p417_p4 = pnand %p416_p3, %p410_p0 }
  0xc4   :  { %v115_v8 = vpop.f32.mrf.mxu0 }
  0xc5   :  { %v116_v9 = vadd.f32 %v361_v7, %v115_v8 }
  0xc6   :  { %v382_v10 = vpop.f32.mrf.mxu0 }
  0xc7   :  { %v120_v11 = vmul.f32 0.70710677, %v116_v9  ;;  %v119_v13 = vmul.f32 0.5, %v116_v9 }
  0xc9   :  { %403 = verf.f32 %v120_v11 }
  0xd6   :  { %v404_v12 = vpop.eup %403 }
  0xd7   :  { %v122_v14 = vadd.f32 1.0, %v404_v12 }
  0xd9   :  { %v123_v15 = vmul.f32 %v122_v14, %v119_v13 }
  0xdb   :  { %388 = vmatmul.mubr.msk.f32.vlgmr.msra.gmra.mxu1 %vm133_vm2, %v123_v15  ;;  %395 = vmatmul.mubr.msk.f32.vlgmr.msra.gmra.mxu0 %vm133_vm2, %v123_v15 }
 0x19b   :  { %v203_v18 = vpop.f32.mrf.mxu1  ;;  %v282_v19 = vpop.f32.mrf.mxu0 }
 0x19c   :  { %v204_v21 = vadd.f32 %v363_v16, %v203_v18  ;;  %v283_v22 = vadd.f32 %v365_v17, %v282_v19 }
 0x19d   :  { %v389_v23 = vpop.f32.mrf.mxu1  ;;  %v396_v24 = vpop.f32.mrf.mxu0 }
 0x19e   :  { %v286_v25 = vand.u32 2147483647, %v204_v21  ;;  %v287_v26 = vand.u32 2147483647, %v283_v22  ;;  %v326_v27 = vmul.f32 %v369_v20, %v283_v22  ;;  %v313_v35 = vmul.f32 %v368_v33, %v283_v22 }
 0x1a0   :  { %v288_v28 = vadd.f32 %v287_v26, %v286_v25  ;;  %328 = vrot.lane.b32.xlu1 %v326_v27, %s455_s28 }
 0x1a2   :  { %v367_v29 = vmul.f32 -1.442695, %v288_v28 }
 0x1a4   :  { %405 = vpow2.f32 %v367_v29 }
 0x1b1   :  { %v406_v30 = vpop.eup %405 }
 0x1b2   :  { %v292_v31 = vadd.f32 1.0, %v406_v30 }
 0x1b4   :  { %407 = vrcp.f32 %v292_v31 }
 0x1c1   :  { %v408_v32 = vpop.eup %407 }
 0x1c2   :  { %299 = vrot.lane.b32.xlu0 %v408_v32, %s456_s8  ;;  %305 = vst.msk [vmem:[#allocation4] sm:$0xff] %vm296_vm3, %v408_v32  ;;  %v295_v34 = vmul.f32 %v408_v32, %v520_v1 }
 0x1c4   :  { %297 = vst.msk [vmem:[#allocation2] sm:$0xff] %vm296_vm3, %v295_v34 }
 0x1c6   :  { %315 = vrot.lane.b32.xlu0 %v313_v35, %s456_s8 }
 0x234   :  { %v300_v36 = vpop.permute.xlu0 %299 }
 0x235   :  { %v302_v37 = vmul.f32 %v300_v36, %v520_v1 }
 0x237   :  { %304 = vst.msk [vmem:[#allocation2] sm:$0xff] %vm303_vm4, %v302_v37 }
 0x238   :  { %v316_v38 = vpop.permute.xlu0 %315 }
 0x239   :  { %420 = shalt.err (!%p417_p4)
}
 0x23a   :  { %342 = dma.vmem_to_hbm [thread:$0]  %s340_s30, 128, %s569_s9, [#allocation3]   ;;  %v329_v39 = vpop.permute.xlu1 %328  ;;  %318 = vst.msk [vmem:[#allocation4] sm:$0xff] %vm303_vm4, %v316_v38 }
 0x23b   :  { %332 = vst.msk [vmem:[#allocation4] sm:$0xff] %vm331_vm5, %v329_v39  ;;  %s429_s15 = scalar_lea.vmem %s350_s12, 128  ;;  %p434_p6 = scmp.lt.s32.totalorder %s350_s12, %s350_s12 }
 0x23c   :  { %p430_p5 = scmp.ne.s32.totalorder %s350_s12, %s429_s15  ;;  %p435_p7 = scmp.lt.s32.totalorder %s429_s15, %s429_s15 }
 0x23e   :  { %p436_p8 = por %p435_p7, %p434_p6 }
 0x240   :  { %p437_p9 = pnand %p436_p8, %p430_p5 }
 0x242   :  { %440 = shalt.err (!%p437_p9)
}
 0x243   :  { %352 = dma.vmem_to_hbm [thread:$0]  %s350_s12, 128, %s570_s10, [#allocation5]  }
 0x244   :  { %449 = dma.done.wait [#allocation3], 128  }
 0x245   :  { %450 = vsyncadd [#allocation3], 4294967168 }
 0x246   :  { %451 = dma.done.wait [#allocation5], 128  }
 0x247   :  { %452 = vsyncadd [#allocation5], 4294967168 }
 0x248   :  { %359 = vsyncpa [#allocation3], 1 }
 0x249   :  { %360 = vsyncpa [#allocation5], 1 }

</bundles_post_ra>
